<compile_context>
chip_gen: v7x
topology: tpu7x:2x2x1
jax: 0.10.0
libtpu: 0.0.40
codegen_flags: <defaults>
</compile_context>

<pallas_src>
import functools
import math

import jax
import jax.numpy as jnp
from jax.experimental import pallas as pl
from jax.experimental.pallas import tpu as pltpu

EPS = 1e-5
# Single-read path budget: rows * td elements (~3 MiB of f32 per strip), so
# double-buffered in/out plus f32 temps stay well under a 32 MiB VMEM limit
# on all generations (v7x has only 64 MiB physical VMEM).
MAX_SINGLE_READ_ELEMS = 768 * 1024
VMEM_LIMIT_BYTES = 32 * 1024 * 1024


def _round_up(x, m):
    return ((x + m - 1) // m) * m


def _pick_td(d_pad, tile_d):
    """Largest multiple of 128 that divides d_pad, is <= tile_d, and (when
    d_pad >= 256) leaves at least 2 D tiles so the 'parallel' D axis can be
    sharded across TensorCores (v7x megacore)."""
    k = d_pad // 128
    cap = max(128, min(tile_d, d_pad if k < 2 else d_pad // 2))
    for m in range(min(cap // 128, k), 0, -1):
        if k % m == 0:
            return 128 * m
    return 128


def _divisor_tds(d_pad, td_max):
    """All multiples of 128 that divide d_pad and are <= td_max, descending."""
    k = d_pad // 128
    return [128 * m for m in range(k, 0, -1) if k % m == 0 and 128 * m <= td_max]


# ----------------------------------------------------------------------------
# Single-read kernel: whole (N, td) strip resident; one HBM read of x.
# ----------------------------------------------------------------------------
def _bn_single_pass_kernel(x_ref, w_ref, b_ref, o_ref, *, inv_n):
    x = x_ref[...].astype(jnp.float32)                    # (N, td), all rows valid
    mean = jnp.sum(x, axis=0, keepdims=True) * inv_n
    xc = x - mean
    var = jnp.sum(xc * xc, axis=0, keepdims=True) * inv_n  # centered -> stable
    scale = jax.lax.rsqrt(var + EPS) * w_ref[...].astype(jnp.float32)
    shift = b_ref[...].astype(jnp.float32)
    o_ref[...] = (xc * scale + shift).astype(o_ref.dtype)


def _single_pass_call(x2d, w_p, b_p, n, d_pad, td, out_dtype):
    d_tiles = d_pad // td
    return pl.pallas_call(
        functools.partial(_bn_single_pass_kernel, inv_n=1.0 / n),
        out_shape=jax.ShapeDtypeStruct((n, d_pad), out_dtype),
        grid_spec=pltpu.PrefetchScalarGridSpec(
            num_scalar_prefetch=0,
            grid=(d_tiles,),
            in_specs=[
                pl.BlockSpec((n, td), lambda j: (0, j)),   # full-extent N block
                pl.BlockSpec((1, td), lambda j: (0, j)),
                pl.BlockSpec((1, td), lambda j: (0, j)),
            ],
            out_specs=pl.BlockSpec((n, td), lambda j: (0, j)),
        ),
        compiler_params=pltpu.CompilerParams(
            dimension_semantics=("parallel",),
            vmem_limit_bytes=VMEM_LIMIT_BYTES),
    )(x2d, w_p, b_p)


# ----------------------------------------------------------------------------
# Two-pass kernel: grid = (D_tiles, 2 passes, N_tiles).
# ----------------------------------------------------------------------------
def _bn_two_pass_kernel(x_ref, w_ref, b_ref, o_ref,
                        sum_ref, sumsq_ref, scale_ref, shift_ref, *, inv_n):
    p = pl.program_id(1)            # 0: stats accumulation, 1: normalize
    i = pl.program_id(2)            # N-tile index (serpentined in pass 1)
    last_i = pl.num_programs(2) - 1

    # ---------------- pass 0: accumulate per-column sum / sum(x^2) ----------
    @pl.when(p == 0)
    def _():
        @pl.when(i == 0)
        def _():
            sum_ref[...] = jnp.zeros_like(sum_ref)
            sumsq_ref[...] = jnp.zeros_like(sumsq_ref)

        x = x_ref[...].astype(jnp.float32)                # (tn, td)
        xg = x.reshape(-1, 8, x.shape[-1])                # vreg-row groups
        # Sublane-dense (8, td) partials: per-tile work is plain VPU adds.
        sum_ref[...] += jnp.sum(xg, axis=0)
        sumsq_ref[...] += jnp.sum(xg * xg, axis=0)

        # finalize: fold mean/var + affine into per-column scale & shift
        @pl.when(i == last_i)
        def _():
            s = jnp.sum(sum_ref[...], axis=0, keepdims=True)    # one XLU reduce
            ss = jnp.sum(sumsq_ref[...], axis=0, keepdims=True)
            mean = s * inv_n
            # TODO(synk): E[x^2]-mean^2 can lose precision when |mean| >> std;
            # the clamp avoids NaN but a mean-shifted accumulation would be
            # closer to PyTorch for pathological inputs.
            var = jnp.maximum(ss * inv_n - mean * mean, 0.0)
            scale = jax.lax.rsqrt(var + EPS) * w_ref[...].astype(jnp.float32)
            scale_ref[...] = scale
            shift_ref[...] = b_ref[...].astype(jnp.float32) - mean * scale

    # ---------------- pass 1: elementwise y = x*scale + shift ---------------
    @pl.when(p == 1)
    def _():
        x = x_ref[...].astype(jnp.float32)
        o_ref[...] = (x * scale_ref[...] + shift_ref[...]).astype(o_ref.dtype)


def _two_pass_call(x2d, w_p, b_p, n, d_pad, tn, td, n_pad, out_dtype):
    n_tiles = n_pad // tn
    d_tiles = d_pad // td
    grid = (d_tiles, 2, n_tiles)

    # Serpentine N in pass 1: the tile resident at the end of pass 0
    # (block n_tiles-1) is consumed first, saving one DMA per D tile.
    x_map = lambda j, p, i: (i + p * (n_tiles - 1 - 2 * i), j)
    # Output block is pinned to (n_tiles-1, j) during pass 0 -- the SAME block
    # pass 1 writes FIRST -- so an un-written output buffer is never flushed.
    # (Pallas only flushes an output buffer when its block index changes.)
    out_map = lambda j, p, i: (n_tiles - 1 - p * i, j)

    return pl.pallas_call(
        functools.partial(_bn_two_pass_kernel, inv_n=1.0 / n),
        out_shape=jax.ShapeDtypeStruct((n_pad, d_pad), out_dtype),
        grid_spec=pltpu.PrefetchScalarGridSpec(
            num_scalar_prefetch=0,
            grid=grid,
            in_specs=[
                pl.BlockSpec((tn, td), x_map),                     # x tiles
                pl.BlockSpec((1, td), lambda j, p, i: (0, j)),     # weight
                pl.BlockSpec((1, td), lambda j, p, i: (0, j)),     # bias
            ],
            out_specs=pl.BlockSpec((tn, td), out_map),
            scratch_shapes=[
                pltpu.VMEM((8, td), jnp.float32),   # per-sublane sum partials
                pltpu.VMEM((8, td), jnp.float32),   # per-sublane sumsq partials
                pltpu.VMEM((1, td), jnp.float32),   # folded scale
                pltpu.VMEM((1, td), jnp.float32),   # folded shift
            ],
        ),
        compiler_params=pltpu.CompilerParams(
            dimension_semantics=("parallel", "arbitrary", "arbitrary"),
            vmem_limit_bytes=VMEM_LIMIT_BYTES),
    )(x2d, w_p, b_p)


# ----------------------------------------------------------------------------
# Wrapper
# ----------------------------------------------------------------------------
def batch_normalization(x, weight, bias, *, tile_n=1024, tile_d=512,
                        single_read_max_elems=MAX_SINGLE_READ_ELEMS):
    """x: (..., D); weight/bias: (D,). BatchNorm1d(training) output, same shape."""
    orig_shape = x.shape
    d = orig_shape[-1]
    x2d = x.reshape(-1, d)
    n = x2d.shape[0]
    dtype = x.dtype

    d_pad = _round_up(d, 128)
    td = _pick_td(d_pad, tile_d)
    row_align = {4: 8, 2: 16, 1: 32}.get(jnp.dtype(dtype).itemsize, 8)

    # (1, d_pad) f32 weight/bias (tiny arrays; padding is negligible).
    if d == d_pad:
        w_p = weight.astype(jnp.float32).reshape(1, d_pad)
        b_p = bias.astype(jnp.float32).reshape(1, d_pad)
    else:
        w_p = jnp.zeros((1, d_pad), jnp.float32).at[0, :d].set(weight.astype(jnp.float32))
        b_p = jnp.zeros((1, d_pad), jnp.float32).at[0, :d].set(bias.astype(jnp.float32))

    # ---------------- single-read path (whole N strip fits VMEM budget) -----
    td_s = None
    for cand in _divisor_tds(d_pad, td):
        if n * cand <= single_read_max_elems:
            td_s = cand
            break
    if td_s is not None:
        if d == d_pad:
            x_in = x2d                               # aligned fast path: no pad
        else:
            x_in = jnp.zeros((n, d_pad), dtype).at[:, :d].set(x2d)
        out = _single_pass_call(x_in, w_p, b_p, n, d_pad, td_s, dtype)
        if d != d_pad:
            out = out[:, :d]
        return out.reshape(orig_shape)

    # ---------------- two-pass path (large N) --------------------------------
    # Try to find a tile_n that divides n exactly so no host-side pad/slice is
    # needed (only possible when the columns are also aligned).
    tn = None
    if d == d_pad and n % row_align == 0:
        cap = min(tile_n, n)
        cap -= cap % row_align
        floor = max(row_align, cap // 4)
        t = cap
        while t >= floor:
            if n % t == 0:
                tn = t
                break
            t -= row_align
    if tn is None:
        tn = _round_up(min(tile_n, _round_up(n, row_align)), row_align)
        n_pad = _round_up(n, tn)
    else:
        n_pad = n

    if n_pad == n and d == d_pad:
        x_in = x2d                                   # aligned fast path: no pad
    else:
        # Zero padding is exact: zero rows add 0 to sum/sumsq and we divide by
        # the true n; padded rows/columns are sliced off below.
        x_in = jnp.zeros((n_pad, d_pad), dtype).at[:n, :d].set(x2d)

    out = _two_pass_call(x_in, w_p, b_p, n, d_pad, tn, td, n_pad, dtype)
    if n_pad != n or d != d_pad:
        out = out[:n, :d]
    return out.reshape(orig_shape)


def init_normalization_params(key, embed_dim, dtype=jnp.float32):
    # matches init_parameters(): each param ~ U(-stdv, stdv), stdv = 1/sqrt(size(-1))
    stdv = 1.0 / math.sqrt(embed_dim)
    kw, kb = jax.random.split(key)
    weight = jax.random.uniform(kw, (embed_dim,), dtype=dtype, minval=-stdv, maxval=stdv)
    bias = jax.random.uniform(kb, (embed_dim,), dtype=dtype, minval=-stdv, maxval=stdv)
    return weight, bias


def _reference(x, weight, bias):
    d = x.shape[-1]
    x2d = x.reshape(-1, d).astype(jnp.float32)
    mean = jnp.mean(x2d, axis=0, keepdims=True)
    var = jnp.mean((x2d - mean) ** 2, axis=0, keepdims=True)  # biased
    y = (x2d - mean) / jnp.sqrt(var + EPS) * weight.astype(jnp.float32) \
        + bias.astype(jnp.float32)
    return y.reshape(x.shape)


if __name__ == "__main__":
    key = jax.random.PRNGKey(0)
    k_x, k_p, k_x2, k_x3, k_x4 = jax.random.split(key, 5)

    # Case 1: module-consistent small shapes (batch=2, seq=8, hidden=32)
    # -> single-read path with column padding.
    B, S, D = 2, 8, 32
    x = jax.random.normal(k_x, (B, S, D), dtype=jnp.float32)
    weight, bias = init_normalization_params(k_p, D)
    y = jax.block_until_ready(batch_normalization(x, weight, bias))
    assert jnp.max(jnp.abs(y - _reference(x, weight, bias))) < 1e-4, "case 1 mismatch"

    # Case 2: fully aligned shapes -> single-read fast path, no pad / no slice.
    D2 = 128
    x2 = jax.random.normal(k_x2, (B, S, D2), dtype=jnp.float32)
    w2, b2 = init_normalization_params(k_p, D2)
    y2 = jax.block_until_ready(batch_normalization(x2, w2, b2))
    assert jnp.max(jnp.abs(y2 - _reference(x2, w2, b2))) < 1e-4, "case 2 mismatch"

    # Case 3: force the two-pass path with ragged shapes (padding, multiple
    # N/D tiles, serpentine pass 1).
    B3, S3, D3 = 4, 37, 200
    x3 = jax.random.normal(k_x3, (B3, S3, D3), dtype=jnp.float32)
    w3, b3 = init_normalization_params(k_p, D3)
    y3 = jax.block_until_ready(
        batch_normalization(x3, w3, b3, tile_n=16, tile_d=128,
                            single_read_max_elems=0))
    assert jnp.max(jnp.abs(y3 - _reference(x3, w3, b3))) < 1e-4, "case 3 mismatch"

    # Case 4: force the two-pass path on aligned shapes -> no pad / no slice.
    B4, S4, D4 = 2, 64, 256
    x4 = jax.random.normal(k_x4, (B4, S4, D4), dtype=jnp.float32)
    w4, b4 = init_normalization_params(k_p, D4)
    y4 = jax.block_until_ready(
        batch_normalization(x4, w4, b4, tile_n=32, single_read_max_elems=0))
    assert jnp.max(jnp.abs(y4 - _reference(x4, w4, b4))) < 1e-4, "case 4 mismatch"

    # Case 5: bf16 I/O (packed-row alignment), single-read path.
    D5 = 96
    x5 = jax.random.normal(k_x, (B, S, D5), dtype=jnp.bfloat16)
    w5, b5 = init_normalization_params(k_p, D5)
    y5 = jax.block_until_ready(batch_normalization(x5, w5, b5))
    assert jnp.max(jnp.abs(y5.astype(jnp.float32) - _reference(x5, w5, b5))) < 2e-2, \
        "case 5 mismatch"

    print("KERNEL_OK")
</pallas_src>

<mosaic_0001>
module attributes {stable_mosaic.version = 11 : i64} {
  func.func @_bn_single_pass_kernel(%arg0: i32, %arg1: memref<16x128xf32, #tpu.memory_space<vmem>>, %arg2: memref<1x128xf32, #tpu.memory_space<vmem>>, %arg3: memref<1x128xf32, #tpu.memory_space<vmem>>, %arg4: memref<16x128xf32, #tpu.memory_space<vmem>>) attributes {dimension_semantics = [#tpu.dimension_semantics<parallel>], iteration_bounds = array<i64: 1>, scalar_prefetch = 0 : i64, scratch_operands = 0 : i64, tpu.core_type = #tpu.core_type<tc>, window_params = [{transform_indices = @transform_0, window_bounds = array<i64: 16, 128>}, {transform_indices = @transform_1, window_bounds = array<i64: 1, 128>}, {transform_indices = @transform_2, window_bounds = array<i64: 1, 128>}, {transform_indices = @transform_3, window_bounds = array<i64: 16, 128>}]} {
    %c0 = arith.constant 0 : index
    %c0_0 = arith.constant 0 : index
    %0 = vector.load %arg1[%c0, %c0_0] : memref<16x128xf32, #tpu.memory_space<vmem>>, vector<16x128xf32>
    %cst = arith.constant dense<0.000000e+00> : vector<128xf32>
    %1 = vector.multi_reduction <add>, %0, %cst [0] : vector<16x128xf32> to vector<128xf32>
    %2 = vector.shape_cast %1 : vector<128xf32> to vector<1x128xf32>
    %cst_1 = arith.constant 6.250000e-02 : f32
    %3 = vector.broadcast %cst_1 : f32 to vector<1x128xf32>
    %4 = arith.mulf %2, %3 : vector<1x128xf32>
    %5 = vector.broadcast %4 : vector<1x128xf32> to vector<16x128xf32>
    %6 = arith.subf %0, %5 : vector<16x128xf32>
    %7 = arith.mulf %6, %6 : vector<16x128xf32>
    %cst_2 = arith.constant dense<0.000000e+00> : vector<128xf32>
    %8 = vector.multi_reduction <add>, %7, %cst_2 [0] : vector<16x128xf32> to vector<128xf32>
    %9 = vector.shape_cast %8 : vector<128xf32> to vector<1x128xf32>
    %cst_3 = arith.constant 6.250000e-02 : f32
    %10 = vector.broadcast %cst_3 : f32 to vector<1x128xf32>
    %11 = arith.mulf %9, %10 : vector<1x128xf32>
    %cst_4 = arith.constant 9.99999974E-6 : f32
    %12 = vector.broadcast %cst_4 : f32 to vector<1x128xf32>
    %13 = arith.addf %11, %12 : vector<1x128xf32>
    %14 = math.rsqrt %13 : vector<1x128xf32>
    %c0_5 = arith.constant 0 : index
    %c0_6 = arith.constant 0 : index
    %15 = vector.load %arg2[%c0_5, %c0_6] : memref<1x128xf32, #tpu.memory_space<vmem>>, vector<1x128xf32>
    %16 = arith.mulf %14, %15 : vector<1x128xf32>
    %c0_7 = arith.constant 0 : index
    %c0_8 = arith.constant 0 : index
    %17 = vector.load %arg3[%c0_7, %c0_8] : memref<1x128xf32, #tpu.memory_space<vmem>>, vector<1x128xf32>
    %18 = vector.broadcast %16 : vector<1x128xf32> to vector<16x128xf32>
    %19 = arith.mulf %6, %18 : vector<16x128xf32>
    %20 = vector.broadcast %17 : vector<1x128xf32> to vector<16x128xf32>
    %21 = arith.addf %19, %20 : vector<16x128xf32>
    %c0_9 = arith.constant 0 : index
    %c0_10 = arith.constant 0 : index
    %22 = vector.load %arg4[%c0_9, %c0_10] : memref<16x128xf32, #tpu.memory_space<vmem>>, vector<16x128xf32>
    tpu.vector_store %arg4[%c0_9, %c0_10], %21 {strides = array<i32>} : memref<16x128xf32, #tpu.memory_space<vmem>>, vector<16x128xf32>,
    return
  }
  func.func @transform_0(%arg0: i32) -> (i32, i32) {
    %c0_i32 = arith.constant 0 : i32
    %c0_i32_0 = arith.constant 0 : i32
    return %c0_i32, %arg0 : i32, i32
  }
  func.func @transform_1(%arg0: i32) -> (i32, i32) {
    %c0_i32 = arith.constant 0 : i32
    %c0_i32_0 = arith.constant 0 : i32
    return %c0_i32, %arg0 : i32, i32
  }
  func.func @transform_2(%arg0: i32) -> (i32, i32) {
    %c0_i32 = arith.constant 0 : i32
    %c0_i32_0 = arith.constant 0 : i32
    return %c0_i32, %arg0 : i32, i32
  }
  func.func @transform_3(%arg0: i32) -> (i32, i32) {
    %c0_i32 = arith.constant 0 : i32
    %c0_i32_0 = arith.constant 0 : i32
    return %c0_i32, %arg0 : i32, i32
  }
}

</mosaic_0001>

<bundles_post_ra>
// kernel: tpu_custom_call.1
= control target key start
LH: loop header
LB: loop body
LE: loop exit
PB: predicated region body
PF: predicated region fallthrough
CT: control target
= control target key end

     0   :  { %8 = vsyncpa [#allocation3], 0  ;;  %s204_s0 = inlined_call_operand.hbm [shape: f32[16,128], index: 0, kind: input, shape index: {}]   ;;  %s205_s1 = inlined_call_operand.vmem [shape: f32[1,128], index: 1, kind: input, shape index: {}]   ;;  %s206_s2 = inlined_call_operand.vmem [shape: f32[1,128], index: 2, kind: input, shape index: {}]   ;;  %s207_s3 = inlined_call_operand.hbm [shape: f32[16,128], index: 3, kind: output, shape index: {}]  }
   0x1   :  { %9 = vsyncpa [#allocation4], 0  ;;  %s144_s12 = smov [#allocation2]   ;;  %s96_s16 = scalar_lea.hbm %s204_s0, 256 }
   0x2   :  { %s15_s13 = sshll.u32 %s144_s12, 4  ;;  %p97_p0 = scmp.ne.s32.totalorder %s204_s0, %s96_s16  ;;  %s16_s13 = int_to_ptr.vmem [resolvable:$true] %s15_s13 }
   0x3   :  { %p100_p1 = scmp.lt.u32.totalorder %s96_s16, %s204_s0 }
   0x5   :  { %p102_p2 = pnand %p100_p1, %p97_p0 }
   0x7   :  { %105 = shalt.err (!%p102_p2)
}
   0x8   :  { %s106_s21 = scalar_lea.vmem %s16_s13, 256  ;;  %p111_p4 = scmp.lt.s32.totalorder %s16_s13, %s16_s13 }
   0x9   :  { %p107_p3 = scmp.ne.s32.totalorder %s16_s13, %s106_s21  ;;  %p112_p5 = scmp.lt.s32.totalorder %s106_s21, %s106_s21 }
   0xb   :  { %p113_p6 = por %p112_p5, %p111_p4 }
   0xd   :  { %p114_p7 = pnand %p113_p6, %p107_p3 }
   0xf   :  { %117 = shalt.err (!%p114_p7)
}
  0x10   :  { %s145_s22 = smov 128   ;;  %s146_s23 = smov 8  }
  0x11   :  { %21 = dma.hbm_to_vmem [thread:$0]  %s204_s0, 256, %s16_s13, [#allocation3], %s145_s22, %s145_s22, %s146_s23  }
  0x12   :  { %140 = dma.done.wait [#allocation3], 256  }
  0x13   :  { %141 = vsyncadd [#allocation3], 4294967040  ;;  %v29_v0 = vld [vmem:[#allocation2] sm:$0xff]  ;;  %v30_v1 = vld [vmem:[#allocation2 + $0x8] sm:$0xff]  ;;  %v56_v23 = vlaneseq  ;;  %s147_s29 = smov [#allocation5]  }
  0x14   :  { %v31_v2 = vadd.f32 %v30_v1, %v29_v0  ;;  %v53_v25 = vld [vmem:[%s205_s1] sm:$0x1]  ;;  %s77_s30 = sshll.u32 %s147_s29, 4  ;;  %s78_s30 = int_to_ptr.vmem [resolvable:$true] %s77_s30 }
  0x15   :  { %v57_v24 = vshrl.u32 %v56_v23, 7  ;;  %v89_v30 = vld [vmem:[%s206_s2] ss:$0 sm:$0xff]  ;;  %s118_s4 = scalar_lea.vmem %s78_s30, 256  ;;  %p123_p9 = scmp.lt.s32.totalorder %s78_s30, %s78_s30 }
  0x16   :  { %v32_v3 = vrot.slane %v31_v2, 4  ;;  %p119_p8 = scmp.ne.s32.totalorder %s78_s30, %s118_s4  ;;  %p124_p10 = scmp.lt.s32.totalorder %s118_s4, %s118_s4 }
  0x17   :  { %v58_v26 = vsub.s32 0, %v57_v24 }
  0x18   :  { %v33_v4 = vadd.f32 %v32_v3, %v31_v2  ;;  %p125_p11 = por %p124_p10, %p123_p9 }
  0x1a   :  { %v34_v5 = vrot.slane %v33_v4, 2  ;;  %p126_p12 = pnand %p125_p11, %p119_p8 }
  0x1c   :  { %v35_v6 = vadd.f32 %v34_v5, %v33_v4 }
  0x1e   :  { %v36_v7 = vrot.slane %v35_v6, 1 }
  0x20   :  { %v37_v8 = vadd.f32 %v36_v7, %v35_v6 }
  0x22   :  { %v38_v9 = vmul.f32 0.0625, %v37_v8 }
  0x24   :  { %v39_v10 = vsub.f32 %v29_v0, %v38_v9  ;;  %v40_v11 = vsub.f32 %v30_v1, %v38_v9 }
  0x26   :  { %v41_v12 = vmul.f32 %v39_v10, %v39_v10  ;;  %v42_v13 = vmul.f32 %v40_v11, %v40_v11 }
  0x28   :  { %v43_v14 = vadd.f32 %v42_v13, %v41_v12 }
  0x2a   :  { %v44_v15 = vrot.slane %v43_v14, 4 }
  0x2c   :  { %v45_v16 = vadd.f32 %v44_v15, %v43_v14 }
  0x2e   :  { %v46_v17 = vrot.slane %v45_v16, 2 }
  0x30   :  { %v47_v18 = vadd.f32 %v46_v17, %v45_v16 }
  0x32   :  { %v48_v19 = vrot.slane %v47_v18, 1 }
  0x34   :  { %v49_v20 = vadd.f32 %v48_v19, %v47_v18 }
  0x36   :  { %v50_v21 = vmul.f32 0.0625, %v49_v20 }
  0x38   :  { %v51_v22 = vadd.f32 1e-05, %v50_v21 }
  0x3a   :  { %94 = vrsqrt.f32 %v51_v22 }
  0x44   :  { %v95_v27 = vpop.eup %94 }
  0x45   :  { %v54_v28 = vmul.f32 %v95_v27, %v53_v25 }
  0x47   :  { %v59_v29 = vrot.slane %v54_v28, %v58_v26 }
  0x49   :  { %v60_v31 = vmul.f32 %v59_v29, %v39_v10  ;;  %v61_v32 = vmul.f32 %v59_v29, %v40_v11 }
  0x4b   :  { %v68_v33 = vadd.f32 %v89_v30, %v60_v31  ;;  %v69_v34 = vadd.f32 %v89_v30, %v61_v32 }
  0x4d   :  { %70 = vst [vmem:[#allocation5] sm:$0xff] %v68_v33  ;;  %71 = vst [vmem:[#allocation5 + $0x8] sm:$0xff] %v69_v34 }
  0x4e   :  { %129 = shalt.err (!%p126_p12)
}
  0x4f   :  { %s130_s2 = scalar_lea.hbm %s207_s3, 256 }
  0x50   :  { %p131_p13 = scmp.ne.s32.totalorder %s207_s3, %s130_s2  ;;  %p134_p0 = scmp.lt.u32.totalorder %s130_s2, %s207_s3 }
  0x52   :  { %p136_p1 = pnand %p134_p0, %p131_p13 }
  0x54   :  { %139 = shalt.err (!%p136_p1)
}
  0x55   :  { %83 = dma.vmem_to_hbm [thread:$0]  %s78_s30, 256, %s207_s3, [#allocation4], %s145_s22, %s145_s22, %s146_s23  }
  0x56   :  { %142 = dma.done.wait [#allocation4], 256  }
  0x57   :  { %143 = vsyncadd [#allocation4], 4294967040 }
  0x58   :  { %87 = vsyncpa [#allocation3], 1 }
  0x59   :  { %88 = vsyncpa [#allocation4], 1 }

</bundles_post_ra>
